<compile_context>
chip_gen: v7x
topology: tpu7x:2x2x1
jax: 0.10.0
libtpu: 0.0.40
codegen_flags: <defaults>
</compile_context>

<pallas_src>
import functools

import jax
import jax.numpy as jnp
from jax.experimental import pallas as pl
from jax.experimental.pallas import tpu as pltpu


def _round_up(x, m):
    return (x + m - 1) // m * m


# v7x has 64 MiB VMEM per TensorCore (vs 128 MiB on v5e/v6e); 48 MiB leaves
# headroom on all generations and comfortably covers our worst-case working set
# (< 12 MiB with tm=2048 and 3-deep buffering).
_VMEM_LIMIT = 48 * 1024 * 1024

_BUFFERED = getattr(pl, "Buffered", None)


def _input_spec(block_shape, index_map, buffers=3):
    """BlockSpec with deeper multi-buffering when available (hides HBM jitter)."""
    if _BUFFERED is not None:
        try:
            return pl.BlockSpec(block_shape, index_map,
                                pipeline_mode=_BUFFERED(buffers))
        except TypeError:
            pass
    return pl.BlockSpec(block_shape, index_map)


def _choose_row_tile(m, tm_req=2048):
    """Largest row tile (multiple of 256, <= tm_req) that keeps >=2 blocks on the
    parallel grid axis when the problem is big enough (v7x has 2 TensorCores)."""
    m = max(int(m), 1)
    tm = 256
    while tm * 2 <= tm_req and _round_up(m, tm * 2) // (tm * 2) >= 2:
        tm *= 2
    return tm, _round_up(m, tm)


def _nbr_slots(cin_pad):
    """Smallest neighbor-slot count >= 27 so that n_nbr * cin_pad % 128 == 0."""
    n = 27
    while (n * cin_pad) % 128:
        n += 1
    return n


# ------------------- fused conv (matmul + BN/ReLU + residual) -------------------

def _fused_conv_kernel(*refs, has_res, emit_raw, emit_act):
    it = iter(refs)
    a_ref = next(it)                                  # [tm, K]    bf16 im2col tile
    w_ref = next(it)                                  # [K, Cout]  bf16
    scale_ref = next(it) if emit_act else None        # [1, Cout]  f32
    shift_ref = next(it) if emit_act else None        # [1, Cout]  f32
    res_ref = next(it) if has_res else None           # [tm, Cout] bf16
    out_refs = list(it)

    acc = jnp.dot(a_ref[...], w_ref[...], preferred_element_type=jnp.float32)
    if has_res:
        acc = acc + res_ref[...].astype(jnp.float32)

    oi = 0
    if emit_raw:                                      # residual identity (pre-norm)
        out_refs[oi][...] = acc.astype(out_refs[oi].dtype)
        oi += 1
    if emit_act:                                      # BatchNorm (inference) + ReLU
        y = jnp.maximum(acc * scale_ref[...] + shift_ref[...], 0.0)
        out_refs[oi][...] = y.astype(out_refs[oi].dtype)


def fused_conv(a, w, *, tm, scale=None, shift=None, res=None,
               emit_raw=False, emit_act=True,
               raw_dtype=jnp.bfloat16, act_dtype=jnp.bfloat16):
    """[Mp, K] @ [K, Cout] with optional residual add and fused BN+ReLU epilogue.

    `a` / `res` are already row-padded to Mp (multiple of tm); outputs are kept
    at Mp rows so downstream convs never re-pad.  Returns a tuple (raw?, act?).
    """
    assert emit_raw or emit_act
    Mp, K = a.shape
    Cout = w.shape[1]
    assert Mp % tm == 0, (Mp, tm)

    inputs = [a.astype(jnp.bfloat16), w.astype(jnp.bfloat16)]
    in_specs = [_input_spec((tm, K), lambda i: (i, 0)),        # dominant HBM stream
                pl.BlockSpec((K, Cout), lambda i: (0, 0))]
    if emit_act:
        inputs += [scale.reshape(1, Cout).astype(jnp.float32),
                   shift.reshape(1, Cout).astype(jnp.float32)]
        in_specs += [pl.BlockSpec((1, Cout), lambda i: (0, 0)),
                     pl.BlockSpec((1, Cout), lambda i: (0, 0))]
    has_res = res is not None
    if has_res:
        inputs.append(res.astype(jnp.bfloat16))
        in_specs.append(pl.BlockSpec((tm, Cout), lambda i: (i, 0)))

    out_shapes, out_specs = [], []
    if emit_raw:
        out_shapes.append(jax.ShapeDtypeStruct((Mp, Cout), raw_dtype))
        out_specs.append(pl.BlockSpec((tm, Cout), lambda i: (i, 0)))
    if emit_act:
        out_shapes.append(jax.ShapeDtypeStruct((Mp, Cout), act_dtype))
        out_specs.append(pl.BlockSpec((tm, Cout), lambda i: (i, 0)))

    # TODO(synk): lane-dense (>=128-wide) packed stores for the 32-channel
    # outputs need a (tm,32)->(tm//4,128) sublane->lane repack inside the kernel,
    # which Mosaic does not lower reliably; kept as 32-lane stores (the kernel
    # is input-DMA-bound, so this is second order here).
    kernel = functools.partial(_fused_conv_kernel, has_res=has_res,
                               emit_raw=emit_raw, emit_act=emit_act)
    return pl.pallas_call(
        kernel,
        out_shape=tuple(out_shapes),
        grid=(Mp // tm,),
        in_specs=in_specs,
        out_specs=tuple(out_specs),
        compiler_params=pltpu.CompilerParams(
            dimension_semantics=("parallel",),
            vmem_limit_bytes=_VMEM_LIMIT),
    )(*inputs)


# --------------------------- tiled scatter_mean ---------------------------

def _scatter_mean_kernel(idx_ref, x_ref, o_ref, acc_ref):
    n = pl.program_id(1)

    @pl.when(n == 0)
    def _():
        acc_ref[...] = jnp.zeros_like(acc_ref)

    ts = acc_ref.shape[0]
    seg = (pl.program_id(0) * ts
           + jax.lax.broadcasted_iota(jnp.int32, (ts, 1), 0))     # [ts, 1]
    hit = (seg == idx_ref[...]).astype(x_ref.dtype)               # [ts, tn] one-hot
    # x has an appended ones column, so the count comes out of the same MXU matmul.
    acc_ref[...] += jnp.dot(hit, x_ref[...], preferred_element_type=jnp.float32)

    @pl.when(n == pl.num_programs(1) - 1)
    def _():
        c = o_ref.shape[1]
        cnt = jnp.maximum(acc_ref[:, c:c + 1], 1.0)
        o_ref[...] = (acc_ref[:, :c] / cnt).astype(o_ref.dtype)


def pallas_scatter_mean(x, idx, num_segments, *, out_dtype=jnp.float32,
                        ts=512, tn=1024):
    """scatter_mean(x, idx, dim=0): tiled one-hot MXU reduction over point tiles."""
    # TODO(synk): sorted-segment indexing (single O(N*C) pass over x via
    # PrefetchScalarGridSpec offsets) for production-scale S*N; the one-hot
    # reduction here is quadratic in the voxelization call.
    N, C = x.shape
    S = int(num_segments)
    tn = max(128, min(tn, _round_up(max(N, 1), 128)))
    ts = max(8, min(ts, _round_up(max(S, 1), 8)))
    Np = _round_up(max(N, 1), tn)
    Sp = _round_up(max(S, 1), ts)

    x_aug = jnp.concatenate(
        [x.astype(jnp.bfloat16), jnp.ones((N, 1), jnp.bfloat16)], axis=1)
    x_p = jnp.pad(x_aug, ((0, Np - N), (0, 0)))          # pad rows: idx=-1, never hit
    idx_p = jnp.full((1, Np), -1, jnp.int32).at[0, :N].set(idx.astype(jnp.int32))

    out = pl.pallas_call(
        _scatter_mean_kernel,
        out_shape=jax.ShapeDtypeStruct((Sp, C), out_dtype),
        grid=(Sp // ts, Np // tn),
        in_specs=[pl.BlockSpec((1, tn), lambda si, n: (0, n)),
                  pl.BlockSpec((tn, C + 1), lambda si, n: (n, 0))],
        out_specs=pl.BlockSpec((ts, C), lambda si, n: (si, 0)),
        scratch_shapes=[pltpu.VMEM((ts, C + 1), jnp.float32)],
        compiler_params=pltpu.CompilerParams(
            dimension_semantics=("parallel", "arbitrary"),
            vmem_limit_bytes=_VMEM_LIMIT),
    )(idx_p, x_p)
    return out[:S]


# ----------------------------- glue: sparse conv ---------------------------

def build_neighbor_table(voxel_coords, spatial_shape, batch_size, sentinel):
    """Indices of each active voxel's 27 (3x3x3) active neighbors; missing /
    out-of-bounds neighbors get `sentinel` (out of range for the feature array,
    so jnp.take(..., mode='fill', fill_value=0) reads zeros)."""
    # TODO(synk): for production spatial shapes replace the dense
    # (batch, D, H, W) lookup grid with a hashed linearized-coord lookup.
    D, H, W = spatial_shape
    M = voxel_coords.shape[0]
    b = voxel_coords[:, 0].astype(jnp.int32)
    z = voxel_coords[:, 1].astype(jnp.int32)
    y = voxel_coords[:, 2].astype(jnp.int32)
    x = voxel_coords[:, 3].astype(jnp.int32)

    grid = jnp.full((batch_size, D, H, W), sentinel, jnp.int32)
    grid = grid.at[b, z, y, x].set(jnp.arange(M, dtype=jnp.int32))

    offsets = jnp.array([(dz, dy, dx)
                         for dz in (-1, 0, 1)
                         for dy in (-1, 0, 1)
                         for dx in (-1, 0, 1)], dtype=jnp.int32)   # [27, 3]
    nz = z[:, None] + offsets[None, :, 0]
    ny = y[:, None] + offsets[None, :, 1]
    nx = x[:, None] + offsets[None, :, 2]
    inb = (nz >= 0) & (nz < D) & (ny >= 0) & (ny < H) & (nx >= 0) & (nx < W)
    idx = grid[b[:, None],
               jnp.clip(nz, 0, D - 1),
               jnp.clip(ny, 0, H - 1),
               jnp.clip(nx, 0, W - 1)]
    return jnp.where(inb, idx, sentinel)                            # [M, 27]


def _pad_nbr(nbr27, m_pad, n_nbr):
    """Pad the [M, 27] table to [Mp, n_nbr]; padded rows/columns -> sentinel."""
    M = nbr27.shape[0]
    out = jnp.full((m_pad, n_nbr), m_pad, jnp.int32)
    return out.at[:M, :27].set(nbr27)


def gather_neighbors(h, nbr_idx):
    """im2col for SubMConv3d: [Mp, C] -> [Mp, n_nbr*C] bf16, already row-padded
    and K-aligned; sentinel (out-of-range) indices read as zeros (mode='fill')."""
    # TODO(synk): an in-kernel gather (VMEM-resident h + scalar-prefetched
    # nbr_idx) would remove this ~27x HBM materialization, but Mosaic has no
    # reliable lowering for arbitrary dynamic row gathers from large VMEM arrays.
    Mp, C = h.shape
    n_nbr = nbr_idx.shape[1]
    g = jnp.take(h.astype(jnp.bfloat16), nbr_idx, axis=0,
                 mode='fill', fill_value=0)
    return g.reshape(Mp, n_nbr * C)


def _pad_conv_weight(w, cin, cin_pad, n_nbr, cout):
    """[27*cin, cout] -> [n_nbr*cin_pad, cout] bf16, zero rows for the padding."""
    w3 = w.reshape(27, cin, cout).astype(jnp.float32)
    wp = jnp.zeros((n_nbr, cin_pad, cout), jnp.float32)
    wp = wp.at[:27, :cin, :].set(w3)
    return wp.reshape(n_nbr * cin_pad, cout).astype(jnp.bfloat16)


# ----------------------------- parameters ---------------------------------

def init_params(key, input_channel=6, media=32, block_reps=2):
    eps = 1e-4  # norm_fn = BatchNorm1d(eps=1e-4)

    def conv_w(k, cin, cout):
        w = jax.random.normal(k, (27, cin, cout), jnp.float32)
        w = w / jnp.sqrt(27.0 * cin)
        return w.reshape(27 * cin, cout)

    def bn_params(c):
        gamma = jnp.ones((c,), jnp.float32)      # init_weights: constant_(w, 1)
        beta = jnp.zeros((c,), jnp.float32)      # init_weights: constant_(b, 0)
        running_mean = jnp.zeros((c,), jnp.float32)
        running_var = jnp.ones((c,), jnp.float32)
        scale = gamma / jnp.sqrt(running_var + eps)
        shift = beta - running_mean * scale
        return scale, shift

    keys = jax.random.split(key, 1 + 2 * block_reps)
    params = {"input_conv_w": conv_w(keys[0], input_channel, media)}
    blocks = []
    ki = 1
    for _ in range(block_reps):
        blocks.append({
            "bn1": bn_params(media),
            "conv1_w": conv_w(keys[ki], media, media),
            "bn2": bn_params(media),
            "conv2_w": conv_w(keys[ki + 1], media, media),
        })
        ki += 2
    params["unet_blocks"] = blocks
    params["out_bn"] = bn_params(media)
    return params


# ----------------------------- forward (feat) ------------------------------

def point_extractor_feat(params, voxel_coords, p2v_map, v2p_map, spatial_shape,
                         feats, superpoints, batch_offsets, *, num_superpoints,
                         media=32, tm_req=2048):
    batch_size = int(batch_offsets.shape[0]) - 1
    M = int(voxel_coords.shape[0])
    cin = int(feats.shape[1])
    blocks = params["unet_blocks"]
    assert len(blocks) >= 1

    # One fixed row-padded geometry for the whole voxel pipeline (no re-padding).
    tm, Mp = _choose_row_tile(M, tm_req)

    # Channel / neighbor-slot padding so every im2col K is a multiple of 128.
    cin_pad = max(8, _round_up(cin, 8))
    nbr_in_slots = _nbr_slots(cin_pad)      # e.g. 32 * 8  = 256
    nbr_med_slots = _nbr_slots(media)       # e.g. 28 * 32 = 896

    # pointgroup_ops.voxelization(feats, v2p_map), mean mode; segments requested
    # at Mp so the output is already conv-padded (extra rows have no points -> 0).
    feats_p = jnp.pad(feats.astype(jnp.float32), ((0, 0), (0, cin_pad - cin)))
    voxel_feats = pallas_scatter_mean(feats_p, v2p_map, Mp,
                                      out_dtype=jnp.bfloat16)      # [Mp, cin_pad]

    nbr27 = build_neighbor_table(voxel_coords, spatial_shape, batch_size,
                                 sentinel=Mp)                      # [M, 27]
    nbr_in = _pad_nbr(nbr27, Mp, nbr_in_slots)                     # [Mp, 32]
    nbr_med = _pad_nbr(nbr27, Mp, nbr_med_slots)                   # [Mp, 28]

    w_in = _pad_conv_weight(params["input_conv_w"], cin, cin_pad,
                            nbr_in_slots, media)
    w_blk = [(_pad_conv_weight(b["conv1_w"], media, media, nbr_med_slots, media),
              _pad_conv_weight(b["conv2_w"], media, media, nbr_med_slots, media))
             for b in blocks]

    # input_conv fused with block 0's bn1+ReLU epilogue:
    #   x_raw = input_conv(voxel_feats)   (bf16 residual identity)
    #   h     = relu(bn1(x_raw))          (bf16, feeds next gather)
    x_raw, h = fused_conv(gather_neighbors(voxel_feats, nbr_in), w_in, tm=tm,
                          scale=blocks[0]["bn1"][0], shift=blocks[0]["bn1"][1],
                          emit_raw=True, emit_act=True)

    # unet: top-level block_reps ResidualBlocks at `media` channels.
    # TODO(synk): UBlock encoder/decoder recursion (strided SparseConv3d
    # downsample, SparseInverseConv3d upsample, skip concat, return_blocks) has
    # no clean Pallas equivalent here and is not implemented.
    for bi, blk in enumerate(blocks):
        w1, w2 = w_blk[bi]
        # conv1 fused with bn2+ReLU epilogue.
        (h_mid,) = fused_conv(gather_neighbors(h, nbr_med), w1, tm=tm,
                              scale=blk["bn2"][0], shift=blk["bn2"][1],
                              emit_raw=False, emit_act=True)
        if bi + 1 < len(blocks):
            # conv2 + residual add, fused with the NEXT block's bn1+ReLU.
            nscale, nshift = blocks[bi + 1]["bn1"]
            x_raw, h = fused_conv(gather_neighbors(h_mid, nbr_med), w2, tm=tm,
                                  scale=nscale, shift=nshift, res=x_raw,
                                  emit_raw=True, emit_act=True)
        else:
            # last block: conv2 + residual add, fused with output_layer BN+ReLU.
            oscale, oshift = params["out_bn"]
            (v,) = fused_conv(gather_neighbors(h_mid, nbr_med), w2, tm=tm,
                              scale=oscale, shift=oshift, res=x_raw,
                              emit_raw=False, emit_act=True)

    # x.features[p2v_map.long()]: voxel features back to points (XLA gather glue).
    point_feats = jnp.take(v, p2v_map.astype(jnp.int32), axis=0)    # [N, media]

    # scatter_mean over superpoints (pool='mean')
    return pallas_scatter_mean(point_feats, superpoints, num_superpoints,
                               out_dtype=jnp.float32)               # [S, media]


# ----------------------------- demo ---------------------------------------

if __name__ == "__main__":
    key = jax.random.PRNGKey(0)
    input_channel = 6
    media = 32
    batch_size = 2
    D = H = W = 16
    spatial_shape = (D, H, W)
    voxels_per_batch = 24
    points_per_batch = 48
    M = batch_size * voxels_per_batch
    N = batch_size * points_per_batch
    num_superpoints = 8

    k_c0, k_c1, k_feat, k_param = jax.random.split(key, 4)

    # deterministic unique voxel coords per batch: (b, z, y, x)
    coords = []
    for b, kc in enumerate((k_c0, k_c1)):
        flat = jax.random.permutation(kc, D * H * W)[:voxels_per_batch]
        z = (flat // (H * W)).astype(jnp.int32)
        y = ((flat // W) % H).astype(jnp.int32)
        x = (flat % W).astype(jnp.int32)
        bcol = jnp.full((voxels_per_batch,), b, jnp.int32)
        coords.append(jnp.stack([bcol, z, y, x], axis=1))
    voxel_coords = jnp.concatenate(coords, axis=0)                  # [M, 4]

    # point -> voxel mapping; points of batch b only map into batch b's voxels
    p2v = [b * voxels_per_batch
           + (jnp.arange(points_per_batch, dtype=jnp.int32) % voxels_per_batch)
           for b in range(batch_size)]
    p2v_map = jnp.concatenate(p2v, axis=0)                          # [N]
    v2p_map = p2v_map

    feats = jax.random.normal(k_feat, (N, input_channel), jnp.float32)
    superpoints = jnp.arange(N, dtype=jnp.int32) % num_superpoints
    batch_offsets = jnp.array([0, points_per_batch, 2 * points_per_batch],
                              jnp.int32)

    params = init_params(k_param, input_channel, media, block_reps=2)

    out = point_extractor_feat(params, voxel_coords, p2v_map, v2p_map,
                               spatial_shape, feats, superpoints, batch_offsets,
                               num_superpoints=num_superpoints, media=media)
    out = jax.block_until_ready(out)
    assert out.shape == (num_superpoints, media), out.shape
    assert bool(jnp.all(jnp.isfinite(out)))
    print("KERNEL_OK")
</pallas_src>

<mosaic_0001>
module attributes {stable_mosaic.version = 11 : i64} {
  func.func @_scatter_mean_kernel(%arg0: i32, %arg1: i32, %arg2: memref<1x128xi32, #tpu.memory_space<vmem>>, %arg3: memref<128x9xbf16, #tpu.memory_space<vmem>>, %arg4: memref<256x8xbf16, #tpu.memory_space<vmem>>, %arg5: memref<256x9xf32, #tpu.memory_space<vmem>>) attributes {dimension_semantics = [#tpu.dimension_semantics<parallel>, #tpu.dimension_semantics<arbitrary>], iteration_bounds = array<i64: 1, 1>, scalar_prefetch = 0 : i64, scratch_operands = 1 : i64, tpu.core_type = #tpu.core_type<tc>, window_params = [{transform_indices = @transform_0, window_bounds = array<i64: 1, 128>}, {transform_indices = @transform_1, window_bounds = array<i64: 128, 9>}, {transform_indices = @transform_2, window_bounds = array<i64: 256, 8>}]} {
    %c0_i32 = arith.constant 0 : i32
    %0 = arith.cmpi eq, %arg1, %c0_i32 : i32
    %1 = arith.extui %0 : i1 to i32
    %c0_i32_0 = arith.constant 0 : i32
    %2 = arith.cmpi ne, %1, %c0_i32_0 : i32
    scf.if %2 {
      %cst_10 = arith.constant 0.000000e+00 : f32
      %22 = vector.broadcast %cst_10 : f32 to vector<256x9xf32>
      %c0_11 = arith.constant 0 : index
      %c0_12 = arith.constant 0 : index
      %23 = vector.load %arg5[%c0_11, %c0_12] : memref<256x9xf32, #tpu.memory_space<vmem>>, vector<256x9xf32>
      tpu.vector_store %arg5[%c0_11, %c0_12], %22 {strides = array<i32>} : memref<256x9xf32, #tpu.memory_space<vmem>>, vector<256x9xf32>,
    } else {
    }
    %c256_i32 = arith.constant 256 : i32
    %3 = arith.muli %arg0, %c256_i32 : i32
    %4 = tpu.iota {dimensions = array<i32: 0>} : vector<256x1xi32>
    %5 = vector.broadcast %3 : i32 to vector<256x1xi32>
    %6 = arith.addi %5, %4 : vector<256x1xi32>
    %c0 = arith.constant 0 : index
    %c0_1 = arith.constant 0 : index
    %7 = vector.load %arg2[%c0, %c0_1] : memref<1x128xi32, #tpu.memory_space<vmem>>, vector<1x128xi32>
    %8 = vector.broadcast %6 : vector<256x1xi32> to vector<256x128xi32>
    %9 = vector.broadcast %7 : vector<1x128xi32> to vector<256x128xi32>
    %10 = arith.cmpi eq, %8, %9 : vector<256x128xi32>
    %11 = arith.extui %10 : vector<256x128xi1> to vector<256x128xi32>
    %12 = arith.sitofp %11 : vector<256x128xi32> to vector<256x128xf32>
    %13 = arith.truncf %12 : vector<256x128xf32> to vector<256x128xbf16>
    %c0_2 = arith.constant 0 : index
    %c0_3 = arith.constant 0 : index
    %14 = vector.load %arg5[%c0_2, %c0_3] : memref<256x9xf32, #tpu.memory_space<vmem>>, vector<256x9xf32>
    %c0_4 = arith.constant 0 : index
    %c0_5 = arith.constant 0 : index
    %15 = vector.load %arg3[%c0_4, %c0_5] : memref<128x9xbf16, #tpu.memory_space<vmem>>, vector<128x9xbf16>
    %cst = arith.constant dense<0.000000e+00> : vector<256x9xf32>
    %16 = tpu.matmul %13, %15, %cst {dimension_numbers = #tpu.dot_dimension_numbers<[1], [0], [0], [1], [0, 0, 1, 1], [], []>} : vector<256x128xbf16>, vector<128x9xbf16>, vector<256x9xf32> -> vector<256x9xf32>
    %17 = arith.addf %14, %16 : vector<256x9xf32>
    %c0_6 = arith.constant 0 : index
    %c0_7 = arith.constant 0 : index
    %18 = vector.load %arg5[%c0_6, %c0_7] : memref<256x9xf32, #tpu.memory_space<vmem>>, vector<256x9xf32>
    tpu.vector_store %arg5[%c0_6, %c0_7], %17 {strides = array<i32>} : memref<256x9xf32, #tpu.memory_space<vmem>>, vector<256x9xf32>,
    %c0_i32_8 = arith.constant 0 : i32
    %19 = arith.cmpi eq, %arg1, %c0_i32_8 : i32
    %20 = arith.extui %19 : i1 to i32
    %c0_i32_9 = arith.constant 0 : i32
    %21 = arith.cmpi ne, %20, %c0_i32_9 : i32
    scf.if %21 {
      %c0_10 = arith.constant 0 : index
      %c8 = arith.constant 8 : index
      %22 = vector.load %arg5[%c0_10, %c8] : memref<256x9xf32, #tpu.memory_space<vmem>>, vector<256x1xf32>
      %cst_11 = arith.constant 1.000000e+00 : f32
      %23 = vector.broadcast %cst_11 : f32 to vector<256x1xf32>
      %24 = arith.maximumf %22, %23 : vector<256x1xf32>
      %c0_12 = arith.constant 0 : index
      %c0_13 = arith.constant 0 : index
      %25 = vector.load %arg5[%c0_12, %c0_13] : memref<256x9xf32, #tpu.memory_space<vmem>>, vector<256x8xf32>
      %26 = vector.broadcast %24 : vector<256x1xf32> to vector<256x8xf32>
      %27 = arith.divf %25, %26 : vector<256x8xf32>
      %28 = arith.truncf %27 : vector<256x8xf32> to vector<256x8xbf16>
      %c0_14 = arith.constant 0 : index
      %c0_15 = arith.constant 0 : index
      %29 = vector.load %arg4[%c0_14, %c0_15] : memref<256x8xbf16, #tpu.memory_space<vmem>>, vector<256x8xbf16>
      tpu.vector_store %arg4[%c0_14, %c0_15], %28 {strides = array<i32>} : memref<256x8xbf16, #tpu.memory_space<vmem>>, vector<256x8xbf16>,
    } else {
    }
    return
  }
  func.func @transform_0(%arg0: i32, %arg1: i32) -> (i32, i32) {
    %c0_i32 = arith.constant 0 : i32
    %c0_i32_0 = arith.constant 0 : i32
    return %c0_i32, %arg1 : i32, i32
  }
  func.func @transform_1(%arg0: i32, %arg1: i32) -> (i32, i32) {
    %c0_i32 = arith.constant 0 : i32
    %c0_i32_0 = arith.constant 0 : i32
    return %arg1, %c0_i32 : i32, i32
  }
  func.func @transform_2(%arg0: i32, %arg1: i32) -> (i32, i32) {
    %c0_i32 = arith.constant 0 : i32
    %c0_i32_0 = arith.constant 0 : i32
    return %arg0, %c0_i32 : i32, i32
  }
}

</mosaic_0001>

<bundles_post_ra>
// kernel: tpu_custom_call.1
= control target key start
LH: loop header
LB: loop body
LE: loop exit
PB: predicated region body
PF: predicated region fallthrough
CT: control target
= control target key end

     0   :  { %v50_v0 = vlaneseq  ;;  %vm16_vm0 = vcmask 72704   ;;  %v1313_v2 = vmov 0.0   ;;  %v1314_v12 = vmov 1.0|1.0   ;;  %s1768_s1 = inlined_call_operand.vmem [shape: bf16[128,9], index: 1, kind: input, shape index: {}]   ;;  %s1769_s0 = inlined_call_operand.vmem [shape: s32[1,128], index: 0, kind: input, shape index: {}]   ;;  %s1770_s2 = inlined_call_operand.vmem [shape: bf16[256,8], index: 2, kind: output, shape index: {}]  }
   0x1   :  { %v1241_v1 = vld [vmem:[%s1768_s1] sm:$0xff]   ;;  %19 = vst.msk [vmem:[#allocation2 + $0x10] sm:$0xff] %vm16_vm0, %v1313_v2  ;;  %17 = vst.msk [vmem:[#allocation2] sm:$0xff] %vm16_vm0, %v1313_v2  ;;  %v1242_v3 = vld [vmem:[%s1768_s1 + $0x8] sm:$0xff]   ;;  %v1315_v45 = vmov 8  }
   0x2   :  { %18 = vst.msk [vmem:[#allocation2 + $0x8] sm:$0xff] %vm16_vm0, %v1313_v2  ;;  %20 = vst.msk [vmem:[#allocation2 + $0x18] sm:$0xff] %vm16_vm0, %v1313_v2  ;;  %v1369_v4 = vshrl.u32 %v50_v0, 7  ;;  %1172 = vmatprep.subr.bf16.mxu0 %v1241_v1  ;;  %1220 = vmatprep.subr.bf16.mxu1 %v1241_v1  ;;  %v1243_v5 = vld [vmem:[%s1768_s1 + $0x10] sm:$0xff]   ;;  %v1244_v9 = vld [vmem:[%s1768_s1 + $0x18] sm:$0xff]  }
   0x3   :  { %21 = vst.msk [vmem:[#allocation2 + $0x20] sm:$0xff] %vm16_vm0, %v1313_v2  ;;  %22 = vst.msk [vmem:[#allocation2 + $0x28] sm:$0xff] %vm16_vm0, %v1313_v2  ;;  %1173 = vmatpush3.bf16.msra.mxu0 %v1241_v1  ;;  %1228 = vmatpush3.bf16.msra.mxu1 %v1241_v1  ;;  %v1383_v10 = vld [vmem:[%s1769_s0] ss:$0 sm:$0xff]  ;;  %v1246_v13 = vld [vmem:[%s1768_s1 + $0x28] sm:$0xff]  }
   0x4   :  { %23 = vst.msk [vmem:[#allocation2 + $0x30] sm:$0xff] %vm16_vm0, %v1313_v2  ;;  %24 = vst.msk [vmem:[#allocation2 + $0x38] sm:$0xff] %vm16_vm0, %v1313_v2  ;;  %1174 = vmatprep.subr.bf16.mxu0 %v1242_v3  ;;  %1221 = vmatprep.subr.bf16.mxu1 %v1242_v3  ;;  %v52_v6 = vadd.s32 8, %v1369_v4  ;;  %v67_v7 = vadd.s32 128, %v1369_v4  ;;  %v68_v8 = vadd.s32 136, %v1369_v4  ;;  %vm121_vm1 = vcmp.eq.s32.totalorder %v1369_v4, %v1383_v10  ;;  %v1245_v11 = vld [vmem:[%s1768_s1 + $0x20] sm:$0xff]  }
   0x5   :  { %25 = vst.msk [vmem:[#allocation2 + $0x40] sm:$0xff] %vm16_vm0, %v1313_v2  ;;  %26 = vst.msk [vmem:[#allocation2 + $0x48] sm:$0xff] %vm16_vm0, %v1313_v2  ;;  %v1247_v14 = vld [vmem:[%s1768_s1 + $0x30] sm:$0xff]   ;;  %v53_v15 = vadd.s32 16, %v1369_v4  ;;  %v54_v16 = vadd.s32 24, %v1369_v4  ;;  %v69_v17 = vadd.s32 144, %v1369_v4  ;;  %1240 = vset.pattern.permute.xlu0 %v1315_v45  ;;  %1239 = vset.pattern.permute.xlu1 %v1315_v45 }
   0x6   :  { %27 = vst.msk [vmem:[#allocation2 + $0x50] sm:$0xff] %vm16_vm0, %v1313_v2  ;;  %28 = vst.msk [vmem:[#allocation2 + $0x58] sm:$0xff] %vm16_vm0, %v1313_v2  ;;  %vm122_vm2 = vcmp.eq.s32.totalorder %v52_v6, %v1383_v10  ;;  %vm137_vm3 = vcmp.eq.s32.totalorder %v67_v7, %v1383_v10  ;;  %vm138_vm4 = vcmp.eq.s32.totalorder %v68_v8, %v1383_v10  ;;  %v70_v18 = vadd.s32 152, %v1369_v4  ;;  %v1248_v19 = vld [vmem:[%s1768_s1 + $0x38] sm:$0xff]  }
   0x7   :  { %29 = vst.msk [vmem:[#allocation2 + $0x60] sm:$0xff] %vm16_vm0, %v1313_v2  ;;  %30 = vst.msk [vmem:[#allocation2 + $0x68] sm:$0xff] %vm16_vm0, %v1313_v2  ;;  %1175 = vmatpush3.bf16.msra.mxu0 %v1242_v3  ;;  %1229 = vmatpush3.bf16.msra.mxu1 %v1242_v3  ;;  %v55_v20 = vadd.s32 32, %v1369_v4  ;;  %v56_v21 = vadd.s32 40, %v1369_v4  ;;  %v71_v22 = vadd.s32 160, %v1369_v4  ;;  %v72_v23 = vadd.s32 168, %v1369_v4 }
   0x8   :  { %31 = vst.msk [vmem:[#allocation2 + $0x70] sm:$0xff] %vm16_vm0, %v1313_v2  ;;  %32 = vst.msk [vmem:[#allocation2 + $0x78] sm:$0xff] %vm16_vm0, %v1313_v2  ;;  %1176 = vmatprep.subr.bf16.mxu0 %v1243_v5  ;;  %1222 = vmatprep.subr.bf16.mxu1 %v1243_v5  ;;  %vm123_vm7 = vcmp.eq.s32.totalorder %v53_v15, %v1383_v10  ;;  %vm124_vm8 = vcmp.eq.s32.totalorder %v54_v16, %v1383_v10  ;;  %v57_v25 = vadd.s32 48, %v1369_v4  ;;  %v235_v46 = vld [vmem:[#allocation2 + $0x10] sm:$0xff]  ;;  %v233_v48 = vld [vmem:[#allocation2] sm:$0xff] }
   0x9   :  { %33 = vst.msk [vmem:[#allocation2 + $0x80] sm:$0xff] %vm16_vm0, %v1313_v2  ;;  %34 = vst.msk [vmem:[#allocation2 + $0x88] sm:$0xff] %vm16_vm0, %v1313_v2  ;;  %vm139_vm9 = vcmp.eq.s32.totalorder %v69_v17, %v1383_v10  ;;  %vm140_vm10 = vcmp.eq.s32.totalorder %v70_v18, %v1383_v10  ;;  %vm125_vm11 = vcmp.eq.s32.totalorder %v55_v20, %v1383_v10  ;;  %v58_v26 = vadd.s32 56, %v1369_v4  ;;  %v236_v52 = vld [vmem:[#allocation2 + $0x18] sm:$0xff]  ;;  %v234_v58 = vld [vmem:[#allocation2 + $0x8] sm:$0xff] }
   0xa   :  { %35 = vst.msk [vmem:[#allocation2 + $0x90] sm:$0xff] %vm16_vm0, %v1313_v2  ;;  %36 = vst.msk [vmem:[#allocation2 + $0x98] sm:$0xff] %vm16_vm0, %v1313_v2  ;;  %vm126_vm12 = vcmp.eq.s32.totalorder %v56_v21, %v1383_v10  ;;  %vm141_vm14 = vcmp.eq.s32.totalorder %v71_v22, %v1383_v10  ;;  %vm142_vm15 = vcmp.eq.s32.totalorder %v72_v23, %v1383_v10  ;;  %v73_v27 = vadd.s32 176, %v1369_v4  ;;  %v237_v8 = vld [vmem:[#allocation2 + $0x20] sm:$0xff]  ;;  %v238_v16 = vld [vmem:[#allocation2 + $0x28] sm:$0xff] }
   0xb   :  { %37 = vst.msk [vmem:[#allocation2 + $0xa0] sm:$0xff] %vm16_vm0, %v1313_v2  ;;  %38 = vst.msk [vmem:[#allocation2 + $0xa8] sm:$0xff] %vm16_vm0, %v1313_v2  ;;  %1177 = vmatpush3.bf16.msra.mxu0 %v1243_v5  ;;  %1230 = vmatpush3.bf16.msra.mxu1 %v1243_v5  ;;  %v74_v28 = vadd.s32 184, %v1369_v4  ;;  %v59_v29 = vadd.s32 64, %v1369_v4  ;;  %v60_v30 = vadd.s32 72, %v1369_v4  ;;  %v75_v31 = vadd.s32 192, %v1369_v4 }
   0xc   :  { %39 = vst.msk [vmem:[#allocation2 + $0xb0] sm:$0xff] %vm16_vm0, %v1313_v2  ;;  %40 = vst.msk [vmem:[#allocation2 + $0xb8] sm:$0xff] %vm16_vm0, %v1313_v2  ;;  %1178 = vmatprep.subr.bf16.mxu0 %v1244_v9  ;;  %1223 = vmatprep.subr.bf16.mxu1 %v1244_v9  ;;  %v76_v32 = vadd.s32 200, %v1369_v4  ;;  %v61_v33 = vadd.s32 80, %v1369_v4  ;;  %v62_v34 = vadd.s32 88, %v1369_v4  ;;  %v77_v35 = vadd.s32 208, %v1369_v4 }
   0xd   :  { %41 = vst.msk [vmem:[#allocation2 + $0xc0] sm:$0xff] %vm16_vm0, %v1313_v2  ;;  %42 = vst.msk [vmem:[#allocation2 + $0xc8] sm:$0xff] %vm16_vm0, %v1313_v2  ;;  %v78_v36 = vadd.s32 216, %v1369_v4  ;;  %v63_v37 = vadd.s32 96, %v1369_v4  ;;  %v64_v38 = vadd.s32 104, %v1369_v4  ;;  %v79_v39 = vadd.s32 224, %v1369_v4 }
   0xe   :  { %43 = vst.msk [vmem:[#allocation2 + $0xd0] sm:$0xff] %vm16_vm0, %v1313_v2  ;;  %44 = vst.msk [vmem:[#allocation2 + $0xd8] sm:$0xff] %vm16_vm0, %v1313_v2  ;;  %v80_v40 = vadd.s32 232, %v1369_v4  ;;  %v65_v41 = vadd.s32 112, %v1369_v4  ;;  %v66_v42 = vadd.s32 120, %v1369_v4  ;;  %v81_v43 = vadd.s32 240, %v1369_v4 }
   0xf   :  { %45 = vst.msk [vmem:[#allocation2 + $0xe0] sm:$0xff] %vm16_vm0, %v1313_v2  ;;  %46 = vst.msk [vmem:[#allocation2 + $0xe8] sm:$0xff] %vm16_vm0, %v1313_v2  ;;  %1179 = vmatpush3.bf16.msra.mxu0 %v1244_v9  ;;  %1231 = vmatpush3.bf16.msra.mxu1 %v1244_v9  ;;  %v82_v44 = vadd.s32 248, %v1369_v4  ;;  %v239_v6 = vld [vmem:[#allocation2 + $0x30] sm:$0xff] }
  0x10   :  { %47 = vst.msk [vmem:[#allocation2 + $0xf0] sm:$0xff] %vm16_vm0, %v1313_v2  ;;  %48 = vst.msk [vmem:[#allocation2 + $0xf8] sm:$0xff] %vm16_vm0, %v1313_v2  ;;  %1180 = vmatprep.subr.bf16.mxu0 %v1245_v11  ;;  %1224 = vmatprep.subr.bf16.mxu1 %v1245_v11  ;;  %v249_v49 = vld [vmem:[#allocation2 + $0x80] sm:$0xff]  ;;  %v250_v59 = vld [vmem:[#allocation2 + $0x88] sm:$0xff] }
  0x11   :  { %vm1052_vm5 = vmpackc.low %vm122_vm2, %vm121_vm1  ;;  %v251_v47 = vld [vmem:[#allocation2 + $0x90] sm:$0xff]  ;;  %v252_v53 = vld [vmem:[#allocation2 + $0x98] sm:$0xff] }
  0x12   :  { %vm1068_vm6 = vmpackc.low %vm138_vm4, %vm137_vm3  ;;  %1188 = vmatprep.mubr.msk.bf16.mxu0 %vm1052_vm5, %v1314_v12  ;;  %vm127_vm4 = vcmp.eq.s32.totalorder %v57_v25, %v1383_v10  ;;  %vm128_vm5 = vcmp.eq.s32.totalorder %v58_v26, %v1383_v10  ;;  %v253_v9 = vld [vmem:[#allocation2 + $0xa0] sm:$0xff] }
  0x13   :  { %1204 = vmatprep.mubr.msk.bf16.mxu1 %vm1068_vm6, %v1314_v12  ;;  %1181 = vmatpush3.bf16.msra.mxu0 %v1245_v11  ;;  %vm1418_vm13 = vmpackc.low %vm124_vm8, %vm123_vm7  ;;  %vm143_vm6 = vcmp.eq.s32.totalorder %v73_v27, %v1383_v10  ;;  %vm144_vm7 = vcmp.eq.s32.totalorder %v74_v28, %v1383_v10  ;;  %vm129_vm8 = vcmp.eq.s32.totalorder %v59_v29, %v1383_v10  ;;  %v255_v7 = vld [vmem:[#allocation2 + $0xb0] sm:$0xff] }
  0x14   :  { %1232 = vmatpush3.bf16.msra.mxu1 %v1245_v11  ;;  %1182 = vmatprep.subr.bf16.mxu0 %v1246_v13  ;;  %vm1070_vm1 = vmpackc.low %vm140_vm10, %vm139_vm9  ;;  %vm130_vm9 = vcmp.eq.s32.totalorder %v60_v30, %v1383_v10  ;;  %v240_v11 = vld [vmem:[#allocation2 + $0x38] sm:$0xff] }
  0x15   :  { %1225 = vmatprep.subr.bf16.mxu1 %v1246_v13  ;;  %vm1056_vm2 = vmpackc.low %vm126_vm12, %vm125_vm11  ;;  %vm145_vm11 = vcmp.eq.s32.totalorder %v75_v31, %v1383_v10  ;;  %vm146_vm12 = vcmp.eq.s32.totalorder %v76_v32, %v1383_v10 }
  0x16   :  { %vm1072_vm3 = vmpackc.low %vm142_vm15, %vm141_vm14 }
  0x17   :  { %1183 = vmatpush3.bf16.msra.mxu0 %v1246_v13  ;;  %vm1058_vm10 = vmpackc.low %vm128_vm5, %vm127_vm4  ;;  %vm148_vm4 = vcmp.eq.s32.totalorder %v78_v36, %v1383_v10  ;;  %vm133_vm5 = vcmp.eq.s32.totalorder %v63_v37, %v1383_v10  ;;  %v243_v36 = vld [vmem:[#allocation2 + $0x50] sm:$0xff] }
  0x18   :  { %1233 = vmatpush3.bf16.msra.mxu1 %v1246_v13  ;;  %1184 = vmatprep.subr.bf16.mxu0 %v1247_v14  ;;  %vm1060_vm14 = vmpackc.low %vm130_vm9, %vm129_vm8  ;;  %vm149_vm8 = vcmp.eq.s32.totalorder %v79_v39, %v1383_v10  ;;  %vm150_vm9 = vcmp.eq.s32.totalorder %v80_v40, %v1383_v10  ;;  %v256_v13 = vld [vmem:[#allocation2 + $0xb8] sm:$0xff]  ;;  %v259_v37 = vld [vmem:[#allocation2 + $0xd0] sm:$0xff] }
  0x19   :  { %1226 = vmatprep.subr.bf16.mxu1 %v1247_v14  ;;  %vm1076_vm15 = vmpackc.low %vm146_vm12, %vm145_vm11  ;;  %v241_v40 = vld [vmem:[#allocation2 + $0x40] sm:$0xff] }
  0x1a   :  { %vm1080_vm12 = vmpackc.low %vm150_vm9, %vm149_vm8 }
  0x1b   :  { %1185 = vmatpush3.bf16.msra.mxu0 %v1247_v14 }
  0x1c   :  { %1234 = vmatpush3.bf16.msra.mxu1 %v1247_v14  ;;  %1186 = vmatprep.subr.bf16.mxu0 %v1248_v19 }
  0x1d   :  { %1227 = vmatprep.subr.bf16.mxu1 %v1248_v19 }
  0x1f   :  { %1187 = vmatpush3.bf16.msra.mxu0 %v1248_v19 }
  0x20   :  { %1235 = vmatpush3.bf16.msra.mxu1 %v1248_v19  ;;  %v254_v19 = vld [vmem:[#allocation2 + $0xa8] sm:$0xff] }
  0x22   :  { %1189 = vmatmul.mubr.msk.bf16.vlgmr.msra.gmra.mrb[0].mxu0 %vm1418_vm13, %v1314_v12  ;;  %vm1074_vm13 = vmpackc.low %vm144_vm7, %vm143_vm6  ;;  %vm134_vm6 = vcmp.eq.s32.totalorder %v64_v38, %v1383_v10 }
  0x23   :  { %1205 = vmatmul.mubr.msk.bf16.vlgmr.msra.gmra.mrb[0].mxu1 %vm1070_vm1, %v1314_v12  ;;  %1192 = vmatprep.mubr.msk.bf16.mxu0 %vm1056_vm2, %v1314_v12  ;;  %vm131_vm1 = vcmp.eq.s32.totalorder %v61_v33, %v1383_v10  ;;  %vm132_vm2 = vcmp.eq.s32.totalorder %v62_v34, %v1383_v10  ;;  %vm1064_vm11 = vmpackc.low %vm134_vm6, %vm133_vm5 }
  0x24   :  { %1208 = vmatprep.mubr.msk.bf16.mxu1 %vm1072_vm3, %v1314_v12  ;;  %vm147_vm3 = vcmp.eq.s32.totalorder %v77_v35, %v1383_v10  ;;  %vm1062_vm7 = vmpackc.low %vm132_vm2, %vm131_vm1  ;;  %vm152_vm1 = vcmp.eq.s32.totalorder %v82_v44, %v1383_v10 }
  0x2a   :  { %1193 = vmatmul.mubr.msk.bf16.gmra.mrb[4].mxu0 %vm1058_vm10, %v1314_v12  ;;  %vm1078_vm10 = vmpackc.low %vm148_vm4, %vm147_vm3 }
  0x2b   :  { %1209 = vmatmul.mubr.msk.bf16.gmra.mrb[4].mxu1 %vm1074_vm13, %v1314_v12  ;;  %1196 = vmatprep.mubr.msk.bf16.mxu0 %vm1060_vm14, %v1314_v12  ;;  %vm135_vm13 = vcmp.eq.s32.totalorder %v65_v41, %v1383_v10  ;;  %vm136_vm14 = vcmp.eq.s32.totalorder %v66_v42, %v1383_v10  ;;  %v244_v41 = vld [vmem:[#allocation2 + $0x58] sm:$0xff]  ;;  %v257_v42 = vld [vmem:[#allocation2 + $0xc0] sm:$0xff] }
  0x2c   :  { %1212 = vmatprep.mubr.msk.bf16.mxu1 %vm1076_vm15, %v1314_v12  ;;  %vm151_vm15 = vcmp.eq.s32.totalorder %v81_v43, %v1383_v10  ;;  %vm1066_vm2 = vmpackc.low %vm136_vm14, %vm135_vm13 }
  0x2d   :  { %vm1082_vm3 = vmpackc.low %vm152_vm1, %vm151_vm15 }
  0x32   :  { %1197 = vmatmul.mubr.msk.bf16.gmra.mrb[8].mxu0 %vm1062_vm7, %v1314_v12 }
  0x33   :  { %1213 = vmatmul.mubr.msk.bf16.gmra.mrb[8].mxu1 %vm1078_vm10, %v1314_v12  ;;  %1200 = vmatprep.mubr.msk.bf16.mxu0 %vm1064_vm11, %v1314_v12 }
  0x34   :  { %1216 = vmatprep.mubr.msk.bf16.mxu1 %vm1080_vm12, %v1314_v12 }
  0x3a   :  { %1201 = vmatmul.mubr.msk.bf16.gmra.mrb[12].mxu0 %vm1066_vm2, %v1314_v12 }
  0x3b   :  { %1217 = vmatmul.mubr.msk.bf16.gmra.mrb[12].mxu1 %vm1082_vm3, %v1314_v12 }
  0xf5   :  { %v1190_v50 = vpop.f32.mrb[0].mxu0 }
  0xf6   :  { %v1206_v51 = vpop.f32.mrb[0].mxu1  ;;  %v492_v54 = vadd.f32 %v1190_v50, %v235_v46  ;;  %v363_v56 = vpop.f32.mrb[1].mxu0  ;;  %v242_v50 = vld [vmem:[#allocation2 + $0x48] sm:$0xff] }
  0xf7   :  { %v508_v55 = vadd.f32 %v1206_v51, %v251_v47  ;;  %v427_v57 = vpop.f32.mrb[1].mxu1  ;;  %v490_v60 = vadd.f32 %v363_v56, %v233_v48  ;;  %v1191_v62 = vpop.f32.mrb[2].mxu0  ;;  %v260_v47 = vld [vmem:[#allocation2 + $0xd8] sm:$0xff] }
  0xf8   :  { %v506_v61 = vadd.f32 %v427_v57, %v249_v49  ;;  %v1207_v63 = vpop.f32.mrb[2].mxu1  ;;  %525 = vst.msk [vmem:[#allocation2 + $0x10] sm:$0xff] %vm16_vm0, %v492_v54  ;;  %v493_v0 = vadd.f32 %v1191_v62, %v236_v52  ;;  %v366_v2 = vpop.f32.mrb[3].mxu0 }
  0xf9   :  { %541 = vst.msk [vmem:[#allocation2 + $0x90] sm:$0xff] %vm16_vm0, %v508_v55  ;;  %v509_v1 = vadd.f32 %v1207_v63, %v252_v53  ;;  %v430_v3 = vpop.f32.mrb[3].mxu1  ;;  %523 = vst.msk [vmem:[#allocation2] sm:$0xff] %vm16_vm0, %v490_v60  ;;  %v491_v4 = vadd.f32 %v366_v2, %v234_v58  ;;  %v258_v53 = vld [vmem:[#allocation2 + $0xc8] sm:$0xff] }
  0xfa   :  { %539 = vst.msk [vmem:[#allocation2 + $0x80] sm:$0xff] %vm16_vm0, %v506_v61  ;;  %v507_v5 = vadd.f32 %v430_v3, %v250_v59  ;;  %526 = vst.msk [vmem:[#allocation2 + $0x18] sm:$0xff] %vm16_vm0, %v493_v0 }
  0xfb   :  { %542 = vst.msk [vmem:[#allocation2 + $0x98] sm:$0xff] %vm16_vm0, %v509_v1  ;;  %524 = vst.msk [vmem:[#allocation2 + $0x8] sm:$0xff] %vm16_vm0, %v491_v4  ;;  %v247_v4 = vld [vmem:[#allocation2 + $0x70] sm:$0xff] }
  0xfc   :  { %540 = vst.msk [vmem:[#allocation2 + $0x88] sm:$0xff] %vm16_vm0, %v507_v5  ;;  %v263_v5 = vld [vmem:[#allocation2 + $0xf0] sm:$0xff] }
  0xfd   :  { %v1194_v10 = vpop.f32.mrb[4].mxu0 }
  0xfe   :  { %v1210_v12 = vpop.f32.mrb[4].mxu1  ;;  %v496_v14 = vadd.f32 %v1194_v10, %v239_v6  ;;  %v379_v15 = vpop.f32.mrb[5].mxu0  ;;  %v261_v10 = vld [vmem:[#allocation2 + $0xe0] sm:$0xff] }
  0xff   :  { %v512_v17 = vadd.f32 %v1210_v12, %v255_v7  ;;  %v443_v18 = vpop.f32.mrb[5].mxu1  ;;  %v494_v20 = vadd.f32 %v379_v15, %v237_v8  ;;  %v1490_v22 = vld [vmem:[#allocation2 + $0x10] sm:$0xff]  ;;  %v1195_v23 = vpop.f32.mrb[6].mxu0  ;;  %v245_v8 = vld [vmem:[#allocation2 + $0x60] sm:$0xff]  ;;  %v264_v15 = vld [vmem:[#allocation2 + $0xf8] sm:$0xff] }
 0x100   :  { %v1488_v21 = vld [vmem:[#allocation2 + $0x90] sm:$0xff]  ;;  %v510_v24 = vadd.f32 %v443_v18, %v253_v9  ;;  %v1211_v25 = vpop.f32.mrb[6].mxu1  ;;  %529 = vst.msk [vmem:[#allocation2 + $0x30] sm:$0xff] %vm16_vm0, %v496_v14  ;;  %v592_v27 = vmax.f32 %v1490_v22, 1.0  ;;  %v497_v28 = vadd.f32 %v1195_v23, %v240_v11  ;;  %v382_v29 = vpop.f32.mrb[7].mxu0  ;;  %v1498_v33 = vld [vmem:[#allocation2] sm:$0xff] }
 0x101   :  { %v608_v26 = vmax.f32 %v1488_v21, 1.0  ;;  %545 = vst.msk [vmem:[#allocation2 + $0xb0] sm:$0xff] %vm16_vm0, %v512_v17  ;;  %v513_v30 = vadd.f32 %v1211_v25, %v256_v13  ;;  %v446_v31 = vpop.f32.mrb[7].mxu1  ;;  %527 = vst.msk [vmem:[#allocation2 + $0x20] sm:$0xff] %vm16_vm0, %v494_v20  ;;  %v495_v32 = vadd.f32 %v382_v29, %v238_v16  ;;  %v1500_v34 = vld [vmem:[#allocation2 + $0x18] sm:$0xff]  ;;  %v590_v38 = vmax.f32 %v1498_v33, 1.0 }
 0x102   :  { %543 = vst.msk [vmem:[#allocation2 + $0xa0] sm:$0xff] %vm16_vm0, %v510_v24  ;;  %v511_v35 = vadd.f32 %v446_v31, %v254_v19  ;;  %634 = vperm.xlu1 %1239, %v592_v27   ;;  %530 = vst.msk [vmem:[#allocation2 + $0x38] sm:$0xff] %vm16_vm0, %v497_v28  ;;  %v593_v39 = vmax.f32 %v1500_v34, 1.0  ;;  %v1508_v43 = vld [vmem:[#allocation2 + $0x80] sm:$0xff]  ;;  %v1510_v44 = vld [vmem:[#allocation2 + $0x98] sm:$0xff] }
 0x103   :  { %714 = vperm.xlu0 %1240, %v608_v26   ;;  %546 = vst.msk [vmem:[#allocation2 + $0xb8] sm:$0xff] %vm16_vm0, %v513_v30  ;;  %528 = vst.msk [vmem:[#allocation2 + $0x28] sm:$0xff] %vm16_vm0, %v495_v32  ;;  %v606_v58 = vmax.f32 %v1508_v43, 1.0  ;;  %v609_v59 = vmax.f32 %v1510_v44, 1.0  ;;  %v1516_v0 = vld [vmem:[#allocation2 + $0x88] sm:$0xff]  ;;  %v248_v9 = vld [vmem:[#allocation2 + $0x78] sm:$0xff] }
 0x104   :  { %544 = vst.msk [vmem:[#allocation2 + $0xa8] sm:$0xff] %vm16_vm0, %v511_v35  ;;  %v1518_v1 = vld [vmem:[#allocation2 + $0x8] sm:$0xff]  ;;  %v607_v6 = vmax.f32 %v1516_v0, 1.0 }
 0x105   :  { %v1198_v45 = vpop.f32.mrb[8].mxu0  ;;  %v591_v7 = vmax.f32 %v1518_v1, 1.0  ;;  %v246_v18 = vld [vmem:[#allocation2 + $0x68] sm:$0xff] }
 0x106   :  { %v1214_v46 = vpop.f32.mrb[8].mxu1  ;;  %639 = vperm.xlu1 %1239, %v593_v39   ;;  %v500_v48 = vadd.f32 %v1198_v45, %v243_v36  ;;  %v395_v49 = vpop.f32.mrb[9].mxu0  ;;  %v262_v23 = vld [vmem:[#allocation2 + $0xe8] sm:$0xff] }
 0x107   :  { %624 = vperm.xlu0 %1240, %v590_v38   ;;  %v516_v51 = vadd.f32 %v1214_v46, %v259_v37  ;;  %v459_v52 = vpop.f32.mrb[9].mxu1  ;;  %v498_v54 = vadd.f32 %v395_v49, %v241_v40  ;;  %v1199_v55 = vpop.f32.mrb[10].mxu0  ;;  %v1528_v11 = vld [vmem:[#allocation2 + $0x30] sm:$0xff] }
 0x108   :  { %v514_v56 = vadd.f32 %v459_v52, %v257_v42  ;;  %v1215_v57 = vpop.f32.mrb[10].mxu1  ;;  %533 = vst.msk [vmem:[#allocation2 + $0x50] sm:$0xff] %vm16_vm0, %v500_v48  ;;  %v501_v60 = vadd.f32 %v1199_v55, %v244_v41  ;;  %v398_v61 = vpop.f32.mrb[11].mxu0  ;;  %v596_v28 = vmax.f32 %v1528_v11, 1.0  ;;  %v1536_v36 = vld [vmem:[#allocation2 + $0xb0] sm:$0xff]  ;;  %v1548_v42 = vld [vmem:[#allocation2 + $0x20] sm:$0xff] }
 0x109   :  { %549 = vst.msk [vmem:[#allocation2 + $0xd0] sm:$0xff] %vm16_vm0, %v516_v51  ;;  %v517_v62 = vadd.f32 %v1215_v57, %v260_v47  ;;  %v462_v63 = vpop.f32.mrb[11].mxu1  ;;  %531 = vst.msk [vmem:[#allocation2 + $0x40] sm:$0xff] %vm16_vm0, %v498_v54  ;;  %v499_v2 = vadd.f32 %v398_v61, %v242_v50  ;;  %v1530_v12 = vld [vmem:[#allocation2 + $0x38] sm:$0xff]  ;;  %v612_v40 = vmax.f32 %v1536_v36, 1.0  ;;  %v594_v46 = vmax.f32 %v1548_v42, 1.0 }
 0x10a   :  { %547 = vst.msk [vmem:[#allocation2 + $0xc0] sm:$0xff] %vm16_vm0, %v514_v56  ;;  %v515_v3 = vadd.f32 %v462_v63, %v258_v53  ;;  %719 = vperm.xlu1 %1239, %v609_v59   ;;  %534 = vst.msk [vmem:[#allocation2 + $0x58] sm:$0xff] %vm16_vm0, %v501_v60  ;;  %v597_v29 = vmax.f32 %v1530_v12, 1.0  ;;  %v1538_v37 = vld [vmem:[#allocation2 + $0xb8] sm:$0xff]  ;;  %v1550_v45 = vld [vmem:[#allocation2 + $0x28] sm:$0xff] }
 0x10b   :  { %704 = vperm.xlu0 %1240, %v606_v58   ;;  %550 = vst.msk [vmem:[#allocation2 + $0xd8] sm:$0xff] %vm16_vm0, %v517_v62  ;;  %532 = vst.msk [vmem:[#allocation2 + $0x48] sm:$0xff] %vm16_vm0, %v499_v2  ;;  %v613_v41 = vmax.f32 %v1538_v37, 1.0  ;;  %v595_v47 = vmax.f32 %v1550_v45, 1.0  ;;  %v1554_v48 = vld [vmem:[#allocation2 + $0xa0] sm:$0xff]  ;;  %v1556_v49 = vld [vmem:[#allocation2 + $0xa8] sm:$0xff] }
 0x10c   :  { %548 = vst.msk [vmem:[#allocation2 + $0xc8] sm:$0xff] %vm16_vm0, %v515_v3  ;;  %v610_v50 = vmax.f32 %v1554_v48, 1.0  ;;  %v611_v51 = vmax.f32 %v1556_v49, 1.0 }
 0x10d   :  { %v1202_v13 = vpop.f32.mrb[12].mxu0 }
 0x10e   :  { %v1218_v14 = vpop.f32.mrb[12].mxu1  ;;  %709 = vperm.xlu1 %1239, %v607_v6   ;;  %v504_v16 = vadd.f32 %v1202_v13, %v247_v4  ;;  %v411_v17 = vpop.f32.mrb[13].mxu0 }
 0x10f   :  { %629 = vperm.xlu0 %1240, %v591_v7   ;;  %v520_v19 = vadd.f32 %v1218_v14, %v263_v5  ;;  %v475_v20 = vpop.f32.mrb[13].mxu1  ;;  %v502_v24 = vadd.f32 %v411_v17, %v245_v8  ;;  %v1203_v25 = vpop.f32.mrb[14].mxu0  ;;  %v1560_v52 = vld [vmem:[#allocation2 + $0x50] sm:$0xff] }
 0x110   :  { %v518_v26 = vadd.f32 %v475_v20, %v261_v10  ;;  %v1219_v27 = vpop.f32.mrb[14].mxu1  ;;  %537 = vst.msk [vmem:[#allocation2 + $0x70] sm:$0xff] %vm16_vm0, %v504_v16  ;;  %v505_v30 = vadd.f32 %v1203_v25, %v248_v9  ;;  %v414_v31 = vpop.f32.mrb[15].mxu0  ;;  %v600_v54 = vmax.f32 %v1560_v52, 1.0  ;;  %v1566_v56 = vld [vmem:[#allocation2 + $0xd0] sm:$0xff]  ;;  %v1572_v60 = vld [vmem:[#allocation2 + $0x40] sm:$0xff] }
 0x111   :  { %553 = vst.msk [vmem:[#allocation2 + $0xf0] sm:$0xff] %vm16_vm0, %v520_v19  ;;  %v521_v32 = vadd.f32 %v1219_v27, %v264_v15  ;;  %v478_v35 = vpop.f32.mrb[15].mxu1  ;;  %535 = vst.msk [vmem:[#allocation2 + $0x60] sm:$0xff] %vm16_vm0, %v502_v24  ;;  %v503_v38 = vadd.f32 %v414_v31, %v246_v18  ;;  %v1562_v53 = vld [vmem:[#allocation2 + $0x58] sm:$0xff]  ;;  %v616_v58 = vmax.f32 %v1566_v56, 1.0  ;;  %v598_v62 = vmax.f32 %v1572_v60, 1.0 }
 0x112   :  { %551 = vst.msk [vmem:[#allocation2 + $0xe0] sm:$0xff] %vm16_vm0, %v518_v26  ;;  %v519_v39 = vadd.f32 %v478_v35, %v262_v23  ;;  %659 = vperm.xlu1 %1239, %v597_v29   ;;  %538 = vst.msk [vmem:[#allocation2 + $0x78] sm:$0xff] %vm16_vm0, %v505_v30  ;;  %v601_v55 = vmax.f32 %v1562_v53, 1.0  ;;  %v1568_v57 = vld [vmem:[#allocation2 + $0xd8] sm:$0xff]  ;;  %v1574_v61 = vld [vmem:[#allocation2 + $0x48] sm:$0xff] }
 0x113   :  { %654 = vperm.xlu0 %1240, %v596_v28   ;;  %554 = vst.msk [vmem:[#allocation2 + $0xf8] sm:$0xff] %vm16_vm0, %v521_v32  ;;  %536 = vst.msk [vmem:[#allocation2 + $0x68] sm:$0xff] %vm16_vm0, %v503_v38  ;;  %v617_v59 = vmax.f32 %v1568_v57, 1.0  ;;  %v599_v63 = vmax.f32 %v1574_v61, 1.0  ;;  %v1578_v2 = vld [vmem:[#allocation2 + $0xc0] sm:$0xff]  ;;  %v1580_v3 = vld [vmem:[#allocation2 + $0xc8] sm:$0xff] }
 0x114   :  { %552 = vst.msk [vmem:[#allocation2 + $0xe8] sm:$0xff] %vm16_vm0, %v519_v39  ;;  %v614_v4 = vmax.f32 %v1578_v2, 1.0  ;;  %v615_v5 = vmax.f32 %v1580_v3, 1.0  ;;  %vm974_vm0 = vcmask 60416  }
 0x116   :  { %739 = vperm.xlu1 %1239, %v613_v41  }
 0x117   :  { %734 = vperm.xlu0 %1240, %v612_v40   ;;  %v1584_v6 = vld [vmem:[#allocation2 + $0x70] sm:$0xff] }
 0x118   :  { %v604_v8 = vmax.f32 %v1584_v6, 1.0  ;;  %v1590_v10 = vld [vmem:[#allocation2 + $0x60] sm:$0xff]  ;;  %v1602_v20 = vld [vmem:[#allocation2 + $0xf0] sm:$0xff] }
 0x119   :  { %v1586_v7 = vld [vmem:[#allocation2 + $0x78] sm:$0xff]  ;;  %v602_v14 = vmax.f32 %v1590_v10, 1.0  ;;  %v1596_v16 = vld [vmem:[#allocation2 + $0xe0] sm:$0xff]  ;;  %v620_v24 = vmax.f32 %v1602_v20, 1.0 }
 0x11a   :  { %649 = vperm.xlu1 %1239, %v595_v47   ;;  %v605_v9 = vmax.f32 %v1586_v7, 1.0  ;;  %v1592_v13 = vld [vmem:[#allocation2 + $0x68] sm:$0xff]  ;;  %v618_v18 = vmax.f32 %v1596_v16, 1.0  ;;  %v1604_v23 = vld [vmem:[#allocation2 + $0xf8] sm:$0xff] }
 0x11b   :  { %644 = vperm.xlu0 %1240, %v594_v46   ;;  %v603_v15 = vmax.f32 %v1592_v13, 1.0  ;;  %v1598_v17 = vld [vmem:[#allocation2 + $0xe8] sm:$0xff]  ;;  %v621_v25 = vmax.f32 %v1604_v23, 1.0 }
 0x11c   :  { %v619_v19 = vmax.f32 %v1598_v17, 1.0 }
 0x11e   :  { %729 = vperm.xlu1 %1239, %v611_v51  }
 0x11f   :  { %724 = vperm.xlu0 %1240, %v610_v50  }
 0x122   :  { %679 = vperm.xlu1 %1239, %v601_v55  }
 0x123   :  { %674 = vperm.xlu0 %1240, %v600_v54  }
 0x126   :  { %759 = vperm.xlu1 %1239, %v617_v59  }
 0x127   :  { %754 = vperm.xlu0 %1240, %v616_v58  }
 0x12a   :  { %669 = vperm.xlu1 %1239, %v599_v63  }
 0x12b   :  { %664 = vperm.xlu0 %1240, %v598_v62  }
 0x12e   :  { %749 = vperm.xlu1 %1239, %v615_v5  }
 0x12f   :  { %744 = vperm.xlu0 %1240, %v614_v4  }
 0x132   :  { %699 = vperm.xlu1 %1239, %v605_v9  }
 0x133   :  { %694 = vperm.xlu0 %1240, %v604_v8  }
 0x136   :  { %689 = vperm.xlu1 %1239, %v603_v15  }
 0x137   :  { %684 = vperm.xlu0 %1240, %v602_v14  }
 0x13a   :  { %769 = vperm.xlu1 %1239, %v619_v19  }
 0x13b   :  { %764 = vperm.xlu0 %1240, %v618_v18  }
 0x13e   :  { %779 = vperm.xlu1 %1239, %v621_v25  }
 0x13f   :  { %774 = vperm.xlu0 %1240, %v620_v24  }
 0x181   :  { %v635_v27 = vpop.permute.xlu1 %634 }
 0x182   :  { %v715_v26 = vpop.permute.xlu0 %714 }
 0x183   :  { %1249 = vrcp.f32 %v715_v26 }
 0x184   :  { %1251 = vrcp.f32 %v635_v27 }
 0x185   :  { %v640_v29 = vpop.permute.xlu1 %639 }
 0x186   :  { %v625_v28 = vpop.permute.xlu0 %624 }
 0x187   :  { %1253 = vrcp.f32 %v625_v28 }
 0x188   :  { %1255 = vrcp.f32 %v640_v29 }
 0x189   :  { %v720_v31 = vpop.permute.xlu1 %719 }
 0x18a   :  { %v705_v30 = vpop.permute.xlu0 %704 }
 0x18b   :  { %1257 = vrcp.f32 %v705_v30 }
 0x18c   :  { %1259 = vrcp.f32 %v720_v31 }
 0x18d   :  { %v1250_v32 = vpop.eup %1249  ;;  %v710_v39 = vpop.permute.xlu1 %709 }
 0x18e   :  { %v1252_v35 = vpop.eup %1251  ;;  %v819_v38 = vmul.f32 %v1250_v32, %v1488_v21  ;;  %v630_v40 = vpop.permute.xlu0 %629  ;;  %1261 = vrcp.f32 %v710_v39 }
 0x18f   :  { %v787_v41 = vmul.f32 %v1252_v35, %v1490_v22  ;;  %1263 = vrcp.f32 %v630_v40 }
 0x190   :  { %v1134_v46 = vpack.c.bf16 %v819_v38, %v819_v38 }
 0x191   :  { %v1254_v47 = vpop.eup %1253  ;;  %v1118_v50 = vpack.c.bf16 %v787_v41, %v787_v41  ;;  %v660_v21 = vpop.permute.xlu1 %659 }
 0x192   :  { %v1256_v51 = vpop.eup %1255  ;;  %993 = vst.msk [vmem:[%s1770_s2 + $0x48] sm:$0xf] %vm974_vm0, %v1134_v46  ;;  %v783_v54 = vmul.f32 %v1254_v47, %v1498_v33  ;;  %v655_v55 = vpop.permute.xlu0 %654 }
 0x193   :  { %977 = vst.msk [vmem:[%s1770_s2 + $0x8] sm:$0xf] %vm974_vm0, %v1118_v50  ;;  %v789_v22 = vmul.f32 %v1256_v51, %v1500_v34  ;;  %1265 = vrcp.f32 %v655_v55 }
 0x194   :  { %v1116_v58 = vpack.c.bf16 %v783_v54, %v783_v54  ;;  %1267 = vrcp.f32 %v660_v21 }
 0x195   :  { %v1258_v59 = vpop.eup %1257  ;;  %v1119_v62 = vpack.c.bf16 %v789_v22, %v789_v22  ;;  %v740_v5 = vpop.permute.xlu1 %739 }
 0x196   :  { %v1260_v63 = vpop.eup %1259  ;;  %975 = vst.msk [vmem:[%s1770_s2] sm:$0xf] %vm974_vm0, %v1116_v58  ;;  %v815_v33 = vmul.f32 %v1258_v59, %v1508_v43  ;;  %v735_v4 = vpop.permute.xlu0 %734 }
 0x197   :  { %978 = vst.msk [vmem:[%s1770_s2 + $0xc] sm:$0xf] %vm974_vm0, %v1119_v62  ;;  %v821_v34 = vmul.f32 %v1260_v63, %v1510_v44  ;;  %1269 = vrcp.f32 %v735_v4 }
 0x198   :  { %v1132_v8 = vpack.c.bf16 %v815_v33, %v815_v33  ;;  %1271 = vrcp.f32 %v740_v5  ;;  %v1262_v9 = vpop.eup %1261 }
 0x199   :  { %v1135_v14 = vpack.c.bf16 %v821_v34, %v821_v34  ;;  %v1264_v15 = vpop.eup %1263  ;;  %v817_v43 = vmul.f32 %v1262_v9, %v1516_v0  ;;  %v650_v19 = vpop.permute.xlu1 %649 }
 0x19a   :  { %991 = vst.msk [vmem:[%s1770_s2 + $0x40] sm:$0xf] %vm974_vm0, %v1132_v8  ;;  %v645_v18 = vpop.permute.xlu0 %644  ;;  %v785_v44 = vmul.f32 %v1264_v15, %v1518_v1 }
 0x19b   :  { %994 = vst.msk [vmem:[%s1770_s2 + $0x4c] sm:$0xf] %vm974_vm0, %v1135_v14  ;;  %1273 = vrcp.f32 %v645_v18  ;;  %v1133_v24 = vpack.c.bf16 %v817_v43, %v817_v43 }
 0x19c   :  { %1275 = vrcp.f32 %v650_v19  ;;  %v1117_v26 = vpack.c.bf16 %v785_v44, %v785_v44 }
 0x19d   :  { %v1266_v25 = vpop.eup %1265  ;;  %992 = vst.msk [vmem:[%s1770_s2 + $0x44] sm:$0xf] %vm974_vm0, %v1133_v24  ;;  %v730_v29 = vpop.permute.xlu1 %729 }
 0x19e   :  { %v1268_v27 = vpop.eup %1267  ;;  %v795_v0 = vmul.f32 %v1266_v25, %v1528_v11  ;;  %v725_v28 = vpop.permute.xlu0 %724  ;;  %976 = vst.msk [vmem:[%s1770_s2 + $0x4] sm:$0xf] %vm974_vm0, %v1117_v26 }
 0x19f   :  { %v797_v1 = vmul.f32 %v1268_v27, %v1530_v12  ;;  %1277 = vrcp.f32 %v725_v28 }
 0x1a0   :  { %v1122_v30 = vpack.c.bf16 %v795_v0, %v795_v0  ;;  %1279 = vrcp.f32 %v730_v29 }
 0x1a1   :  { %v1270_v31 = vpop.eup %1269  ;;  %v1123_v32 = vpack.c.bf16 %v797_v1, %v797_v1  ;;  %v680_v39 = vpop.permute.xlu1 %679 }
 0x1a2   :  { %v1272_v35 = vpop.eup %1271  ;;  %981 = vst.msk [vmem:[%s1770_s2 + $0x18] sm:$0xf] %vm974_vm0, %v1122_v30  ;;  %v827_v11 = vmul.f32 %v1270_v31, %v1536_v36  ;;  %v675_v38 = vpop.permute.xlu0 %674 }
 0x1a3   :  { %982 = vst.msk [vmem:[%s1770_s2 + $0x1c] sm:$0xf] %vm974_vm0, %v1123_v32  ;;  %v829_v12 = vmul.f32 %v1272_v35, %v1538_v37  ;;  %1281 = vrcp.f32 %v675_v38 }
 0x1a4   :  { %v1138_v40 = vpack.c.bf16 %v827_v11, %v827_v11  ;;  %1283 = vrcp.f32 %v680_v39 }
 0x1a5   :  { %v1274_v41 = vpop.eup %1273  ;;  %v1139_v46 = vpack.c.bf16 %v829_v12, %v829_v12  ;;  %v760_v51 = vpop.permute.xlu1 %759 }
 0x1a6   :  { %v1276_v47 = vpop.eup %1275  ;;  %997 = vst.msk [vmem:[%s1770_s2 + $0x58] sm:$0xf] %vm974_vm0, %v1138_v40  ;;  %v791_v36 = vmul.f32 %v1274_v41, %v1548_v42  ;;  %v755_v50 = vpop.permute.xlu0 %754 }
 0x1a7   :  { %998 = vst.msk [vmem:[%s1770_s2 + $0x5c] sm:$0xf] %vm974_vm0, %v1139_v46  ;;  %v793_v37 = vmul.f32 %v1276_v47, %v1550_v45  ;;  %1285 = vrcp.f32 %v755_v50 }
 0x1a8   :  { %v1120_v54 = vpack.c.bf16 %v791_v36, %v791_v36  ;;  %1287 = vrcp.f32 %v760_v51 }
 0x1a9   :  { %v1278_v55 = vpop.eup %1277  ;;  %v1121_v21 = vpack.c.bf16 %v793_v37, %v793_v37  ;;  %v670_v59 = vpop.permute.xlu1 %669 }
 0x1aa   :  { %v1280_v22 = vpop.eup %1279  ;;  %979 = vst.msk [vmem:[%s1770_s2 + $0x10] sm:$0xf] %vm974_vm0, %v1120_v54  ;;  %v823_v42 = vmul.f32 %v1278_v55, %v1554_v48  ;;  %v665_v58 = vpop.permute.xlu0 %664 }
 0x1ab   :  { %980 = vst.msk [vmem:[%s1770_s2 + $0x14] sm:$0xf] %vm974_vm0, %v1121_v21  ;;  %v825_v45 = vmul.f32 %v1280_v22, %v1556_v49  ;;  %1289 = vrcp.f32 %v665_v58 }
 0x1ac   :  { %v1136_v62 = vpack.c.bf16 %v823_v42, %v823_v42  ;;  %1291 = vrcp.f32 %v670_v59 }
 0x1ad   :  { %v1282_v63 = vpop.eup %1281  ;;  %v1137_v33 = vpack.c.bf16 %v825_v45, %v825_v45  ;;  %v750_v34 = vpop.permute.xlu1 %749 }
 0x1ae   :  { %v1284_v4 = vpop.eup %1283  ;;  %995 = vst.msk [vmem:[%s1770_s2 + $0x50] sm:$0xf] %vm974_vm0, %v1136_v62  ;;  %v803_v48 = vmul.f32 %v1282_v63, %v1560_v52  ;;  %v745_v5 = vpop.permute.xlu0 %744 }
 0x1af   :  { %996 = vst.msk [vmem:[%s1770_s2 + $0x54] sm:$0xf] %vm974_vm0, %v1137_v33  ;;  %v805_v49 = vmul.f32 %v1284_v4, %v1562_v53  ;;  %1293 = vrcp.f32 %v745_v5 }
 0x1b0   :  { %v1126_v8 = vpack.c.bf16 %v803_v48, %v803_v48  ;;  %1295 = vrcp.f32 %v750_v34 }
 0x1b1   :  { %v1286_v9 = vpop.eup %1285  ;;  %v1127_v14 = vpack.c.bf16 %v805_v49, %v805_v49  ;;  %v700_v18 = vpop.permute.xlu1 %699 }
 0x1b2   :  { %v1288_v15 = vpop.eup %1287  ;;  %985 = vst.msk [vmem:[%s1770_s2 + $0x28] sm:$0xf] %vm974_vm0, %v1126_v8  ;;  %v835_v52 = vmul.f32 %v1286_v9, %v1566_v56  ;;  %v695_v43 = vpop.permute.xlu0 %694 }
 0x1b3   :  { %986 = vst.msk [vmem:[%s1770_s2 + $0x2c] sm:$0xf] %vm974_vm0, %v1127_v14  ;;  %v837_v53 = vmul.f32 %v1288_v15, %v1568_v57  ;;  %1297 = vrcp.f32 %v695_v43 }
 0x1b4   :  { %v1142_v19 = vpack.c.bf16 %v835_v52, %v835_v52  ;;  %1299 = vrcp.f32 %v700_v18 }
 0x1b5   :  { %v1290_v44 = vpop.eup %1289  ;;  %v1143_v24 = vpack.c.bf16 %v837_v53, %v837_v53  ;;  %v690_v27 = vpop.permute.xlu1 %689 }
 0x1b6   :  { %v1292_v25 = vpop.eup %1291  ;;  %1001 = vst.msk [vmem:[%s1770_s2 + $0x68] sm:$0xf] %vm974_vm0, %v1142_v19  ;;  %v799_v56 = vmul.f32 %v1290_v44, %v1572_v60  ;;  %v685_v26 = vpop.permute.xlu0 %684 }
 0x1b7   :  { %1002 = vst.msk [vmem:[%s1770_s2 + $0x6c] sm:$0xf] %vm974_vm0, %v1143_v24  ;;  %v801_v57 = vmul.f32 %v1292_v25, %v1574_v61  ;;  %1301 = vrcp.f32 %v685_v26 }
 0x1b8   :  { %v1124_v0 = vpack.c.bf16 %v799_v56, %v799_v56  ;;  %1303 = vrcp.f32 %v690_v27 }
 0x1b9   :  { %v1294_v28 = vpop.eup %1293  ;;  %v1125_v29 = vpack.c.bf16 %v801_v57, %v801_v57  ;;  %v770_v31 = vpop.permute.xlu1 %769 }
 0x1ba   :  { %v1296_v1 = vpop.eup %1295  ;;  %983 = vst.msk [vmem:[%s1770_s2 + $0x20] sm:$0xf] %vm974_vm0, %v1124_v0  ;;  %v831_v60 = vmul.f32 %v1294_v28, %v1578_v2  ;;  %v765_v30 = vpop.permute.xlu0 %764 }
 0x1bb   :  { %984 = vst.msk [vmem:[%s1770_s2 + $0x24] sm:$0xf] %vm974_vm0, %v1125_v29  ;;  %v833_v61 = vmul.f32 %v1296_v1, %v1580_v3  ;;  %1305 = vrcp.f32 %v765_v30 }
 0x1bc   :  { %v1140_v32 = vpack.c.bf16 %v831_v60, %v831_v60  ;;  %1307 = vrcp.f32 %v770_v31 }
 0x1bd   :  { %v1298_v35 = vpop.eup %1297  ;;  %v1141_v11 = vpack.c.bf16 %v833_v61, %v833_v61  ;;  %v780_v12 = vpop.permute.xlu1 %779 }
 0x1be   :  { %v1300_v38 = vpop.eup %1299  ;;  %999 = vst.msk [vmem:[%s1770_s2 + $0x60] sm:$0xf] %vm974_vm0, %v1140_v32  ;;  %v811_v2 = vmul.f32 %v1298_v35, %v1584_v6  ;;  %v775_v39 = vpop.permute.xlu0 %774 }
 0x1bf   :  { %1000 = vst.msk [vmem:[%s1770_s2 + $0x64] sm:$0xf] %vm974_vm0, %v1141_v11  ;;  %v813_v3 = vmul.f32 %v1300_v38, %v1586_v7  ;;  %1309 = vrcp.f32 %v775_v39 }
 0x1c0   :  { %v1130_v40 = vpack.c.bf16 %v811_v2, %v811_v2  ;;  %1311 = vrcp.f32 %v780_v12 }
 0x1c1   :  { %v1302_v41 = vpop.eup %1301  ;;  %v1131_v46 = vpack.c.bf16 %v813_v3, %v813_v3 }
 0x1c2   :  { %v1304_v47 = vpop.eup %1303  ;;  %989 = vst.msk [vmem:[%s1770_s2 + $0x38] sm:$0xf] %vm974_vm0, %v1130_v40  ;;  %v807_v6 = vmul.f32 %v1302_v41, %v1590_v10 }
 0x1c3   :  { %990 = vst.msk [vmem:[%s1770_s2 + $0x3c] sm:$0xf] %vm974_vm0, %v1131_v46  ;;  %v809_v7 = vmul.f32 %v1304_v47, %v1592_v13 }
 0x1c4   :  { %v1128_v36 = vpack.c.bf16 %v807_v6, %v807_v6 }
 0x1c5   :  { %v1306_v50 = vpop.eup %1305  ;;  %v1129_v51 = vpack.c.bf16 %v809_v7, %v809_v7 }
 0x1c6   :  { %v1308_v37 = vpop.eup %1307  ;;  %987 = vst.msk [vmem:[%s1770_s2 + $0x30] sm:$0xf] %vm974_vm0, %v1128_v36  ;;  %v839_v54 = vmul.f32 %v1306_v50, %v1596_v16 }
 0x1c7   :  { %988 = vst.msk [vmem:[%s1770_s2 + $0x34] sm:$0xf] %vm974_vm0, %v1129_v51  ;;  %v841_v10 = vmul.f32 %v1308_v37, %v1598_v17 }
 0x1c8   :  { %v1144_v55 = vpack.c.bf16 %v839_v54, %v839_v54 }
 0x1c9   :  { %v1310_v13 = vpop.eup %1309  ;;  %v1145_v21 = vpack.c.bf16 %v841_v10, %v841_v10 }
 0x1ca   :  { %v1312_v22 = vpop.eup %1311  ;;  %1003 = vst.msk [vmem:[%s1770_s2 + $0x70] sm:$0xf] %vm974_vm0, %v1144_v55  ;;  %v843_v42 = vmul.f32 %v1310_v13, %v1602_v20 }
 0x1cb   :  { %1004 = vst.msk [vmem:[%s1770_s2 + $0x74] sm:$0xf] %vm974_vm0, %v1145_v21  ;;  %v845_v16 = vmul.f32 %v1312_v22, %v1604_v23 }
 0x1cc   :  { %v1146_v58 = vpack.c.bf16 %v843_v42, %v843_v42 }
 0x1cd   :  { %v1147_v17 = vpack.c.bf16 %v845_v16, %v845_v16 }
 0x1ce   :  { %1005 = vst.msk [vmem:[%s1770_s2 + $0x78] sm:$0xf] %vm974_vm0, %v1146_v58 }
 0x1cf   :  { %1006 = vst.msk [vmem:[%s1770_s2 + $0x7c] sm:$0xf] %vm974_vm0, %v1147_v17 }

</bundles_post_ra>
